<compile_context>
chip_gen: v6e
topology: v6e:2x2x1
jax: 0.10.0
libtpu: 0.0.40
codegen_flags: <defaults>
</compile_context>

<pallas_src>
import functools

import jax
import jax.numpy as jnp
from jax import lax
from jax.experimental import pallas as pl
from jax.experimental.pallas import tpu as pltpu


def _conv_layer_kernel(xs_ref, xt_ref, w1_ref, b1_ref, w2_ref, b2_ref,
                       gamma_ref, beta_ref, grp_ref, o_ref, *, feature_size):
    # xs_ref:    (1, 5*S, N)  im2col'd input, N = TB*F (batch folded into lanes)
    # xt_ref:    (1, S, N)    unpadded input for the residual
    # w1_ref:    (I, 5*S)     fused conv1 weights (all 5 taps stacked along K)
    # b1_ref:    (I, 1)
    # w2_ref:    (S, I)       pointwise conv2 weights
    # b2_ref:    (S, 1)
    # gamma/beta:(1, N)       LN affine params, tiled across the TB batch groups
    # grp_ref:   (N, N)       block-diagonal ones; segmented sum over each F-lane group
    # o_ref:     (1, S, N)    lane-dense output
    F = feature_size
    xs = xs_ref[0]                                                     # (5S, N)

    # Conv1d(S -> I, k=5, p=2): one fused MXU matmul, K = 5*S, N = TB*F.
    h = jnp.dot(w1_ref[...], xs, preferred_element_type=jnp.float32) + b1_ref[...]   # (I, N)

    # Conv1d(I -> S, k=1): single matmul.
    y2 = jnp.dot(w2_ref[...], h, preferred_element_type=jnp.float32) + b2_ref[...]   # (S, N)

    # ReLU + residual (f32 VPU math on all generations).
    y = xt_ref[0].astype(jnp.float32) + jnp.maximum(y2, 0.0)                          # (S, N)

    # LayerNorm over each F-lane group (one group per folded batch element), eps=1e-6.
    # Segmented mean/var via MXU matmuls with the block-diagonal ones matrix -> the
    # per-group statistic is already broadcast back across its F lanes, no relayout needed.
    inv_f = 1.0 / F
    mean = jnp.dot(y, grp_ref[...], preferred_element_type=jnp.float32) * inv_f       # (S, N)
    d = y - mean
    var = jnp.dot(d * d, grp_ref[...], preferred_element_type=jnp.float32) * inv_f    # (S, N)
    yn = d * lax.rsqrt(var + 1e-6)
    o_ref[0] = (yn * gamma_ref[...] + beta_ref[...]).astype(o_ref.dtype)


def conv_layer_forward(x, w1, b1, w2, b2, gamma, beta, *, batch_tile=None):
    """x: (B, S, F); w1: (I, S, 5); b1: (I,); w2: (S, I, 1); b2: (S,); gamma/beta: (F,)."""
    B, S, F = x.shape
    I = w1.shape[0]
    K = w1.shape[2]              # 5
    P = (K - 1) // 2             # 2

    # Pick TB = smallest divisor of B whose folded lane width TB*F reaches 128 (lane-dense
    # stores), falling back to TB=B if no divisor gets there. grid = B // TB parallel steps.
    if batch_tile is None:
        batch_tile = B
        for tb in range(1, B + 1):
            if B % tb == 0 and tb * F >= 128:
                batch_tile = tb
                break
    TB = batch_tile
    assert B % TB == 0, "batch_tile must divide the batch size"
    NB = B // TB
    N = TB * F

    f32 = jnp.float32

    # --- Wrapper-side layout plumbing (cheap XLA ops, keeps the kernel slice-free) ---
    # im2col: 5 shifted tap windows, batch folded into the lane dimension.
    xp = jnp.pad(x, ((0, 0), (0, 0), (P, P)))                              # (B, S, F+4), zero halo
    wins = jnp.stack([xp[:, :, k:k + F] for k in range(K)], axis=1)        # (B, 5, S, F)
    xs = wins.reshape(NB, TB, K, S, F).transpose(0, 2, 3, 1, 4).reshape(NB, K * S, N)
    # Residual input in the same (S, TB*F) layout.
    xt = x.reshape(NB, TB, S, F).transpose(0, 2, 1, 3).reshape(NB, S, N)

    # Fused conv1 weights: W1[i, k*S + s] = w1[i, s, k]  -> one matmul with K = 5*S.
    w1m = jnp.transpose(w1, (0, 2, 1)).reshape(I, K * S).astype(f32)       # (I, 5*S)
    w2m = w2[:, :, 0].astype(f32)                                          # (S, I)
    b1c = b1.reshape(I, 1).astype(f32)
    b2c = b2.reshape(S, 1).astype(f32)
    gamma_t = jnp.tile(gamma.astype(f32), TB).reshape(1, N)
    beta_t = jnp.tile(beta.astype(f32), TB).reshape(1, N)

    # Block-diagonal ones matrix for segmented LayerNorm stats over each F-lane group.
    lane_grp = jnp.arange(N) // F
    grp = (lane_grp[:, None] == lane_grp[None, :]).astype(f32)             # (N, N)

    kernel = functools.partial(_conv_layer_kernel, feature_size=F)

    out = pl.pallas_call(
        kernel,
        out_shape=jax.ShapeDtypeStruct((NB, S, N), x.dtype),
        grid_spec=pltpu.PrefetchScalarGridSpec(
            num_scalar_prefetch=0,
            grid=(NB,),
            in_specs=[
                pl.BlockSpec((1, K * S, N), lambda g: (g, 0, 0)),   # im2col'd x, per batch-tile
                pl.BlockSpec((1, S, N), lambda g: (g, 0, 0)),       # residual x, per batch-tile
                pl.BlockSpec((I, K * S), lambda g: (0, 0)),         # fused conv1 weights
                pl.BlockSpec((I, 1), lambda g: (0, 0)),             # conv1 bias
                pl.BlockSpec((S, I), lambda g: (0, 0)),             # conv2 weights
                pl.BlockSpec((S, 1), lambda g: (0, 0)),             # conv2 bias
                pl.BlockSpec((1, N), lambda g: (0, 0)),             # LN gamma (tiled)
                pl.BlockSpec((1, N), lambda g: (0, 0)),             # LN beta (tiled)
                pl.BlockSpec((N, N), lambda g: (0, 0)),             # segmented-LN group matrix
            ],
            out_specs=pl.BlockSpec((1, S, N), lambda g: (g, 0, 0)),  # lane-dense output
        ),
        compiler_params=pltpu.CompilerParams(
            dimension_semantics=("parallel",),
            # Explicit VMEM budget (matters once S/I/F scale up, esp. on v7x's 64 MiB/TC).
            vmem_limit_bytes=32 * 1024 * 1024,
        ),
    )(xs, xt, w1m, b1c, w2m, b2c, gamma_t, beta_t, grp)

    # Un-fold the batch dimension back out of the lane axis.
    return out.reshape(NB, S, TB, F).transpose(0, 2, 1, 3).reshape(B, S, F)


def _reference(x, w1, b1, w2, b2, gamma, beta):
    """Pure-JAX reference matching PyTorch semantics (NCL conv, LayerNorm over F, eps=1e-6)."""
    h = lax.conv_general_dilated(x, w1, window_strides=(1,), padding=[(2, 2)],
                                 dimension_numbers=("NCH", "OIH", "NCH"))
    h = h + b1[None, :, None]
    h2 = lax.conv_general_dilated(h, w2, window_strides=(1,), padding=[(0, 0)],
                                  dimension_numbers=("NCH", "OIH", "NCH"))
    h2 = h2 + b2[None, :, None]
    y = x + jnp.maximum(h2, 0.0)
    mean = jnp.mean(y, axis=-1, keepdims=True)
    var = jnp.mean((y - mean) ** 2, axis=-1, keepdims=True)
    return (y - mean) * lax.rsqrt(var + 1e-6) * gamma + beta


if __name__ == "__main__":
    # batch=8, seq_size=8, feature_size=32, intermediate_size=16
    # (TB=4 batches fold into the lanes -> 128-wide lane-dense blocks, grid of 2 parallel steps)
    B, S, F, I = 8, 8, 32, 16
    key = jax.random.PRNGKey(0)
    ks = jax.random.split(key, 5)
    x = jax.random.normal(ks[0], (B, S, F), jnp.float32)
    w1 = jax.random.normal(ks[1], (I, S, 5), jnp.float32) * 0.1
    b1 = jax.random.normal(ks[2], (I,), jnp.float32) * 0.1
    w2 = jax.random.normal(ks[3], (S, I, 1), jnp.float32) * 0.1
    b2 = jax.random.normal(ks[4], (S,), jnp.float32) * 0.1
    gamma = jnp.ones((F,), jnp.float32)
    beta = jnp.zeros((F,), jnp.float32)

    out = conv_layer_forward(x, w1, b1, w2, b2, gamma, beta)
    jax.block_until_ready(out)

    ref = _reference(x, w1, b1, w2, b2, gamma, beta)
    assert out.shape == (B, S, F)
    assert jnp.allclose(out, ref, atol=1e-4, rtol=1e-4), "mismatch vs pure-JAX reference"
    print("KERNEL_OK")
</pallas_src>

<mosaic_0001>
module attributes {stable_mosaic.version = 11 : i64} {
  func.func @_conv_layer_kernel(%arg0: i32, %arg1: memref<1x40x128xf32, #tpu.memory_space<vmem>>, %arg2: memref<1x8x128xf32, #tpu.memory_space<vmem>>, %arg3: memref<16x40xf32, #tpu.memory_space<vmem>>, %arg4: memref<16x1xf32, #tpu.memory_space<vmem>>, %arg5: memref<8x16xf32, #tpu.memory_space<vmem>>, %arg6: memref<8x1xf32, #tpu.memory_space<vmem>>, %arg7: memref<1x128xf32, #tpu.memory_space<vmem>>, %arg8: memref<1x128xf32, #tpu.memory_space<vmem>>, %arg9: memref<128x128xf32, #tpu.memory_space<vmem>>, %arg10: memref<1x8x128xf32, #tpu.memory_space<vmem>>) attributes {dimension_semantics = [#tpu.dimension_semantics<parallel>], iteration_bounds = array<i64: 2>, scalar_prefetch = 0 : i64, scratch_operands = 0 : i64, tpu.core_type = #tpu.core_type<tc>, window_params = [{transform_indices = @transform_0, window_bounds = array<i64: 1, 40, 128>}, {transform_indices = @transform_1, window_bounds = array<i64: 1, 8, 128>}, {pipeline_mode = #tpu.pipeline_mode<synchronous>, transform_indices = @transform_2, window_bounds = array<i64: 16, 40>}, {pipeline_mode = #tpu.pipeline_mode<synchronous>, transform_indices = @transform_3, window_bounds = array<i64: 16, 1>}, {pipeline_mode = #tpu.pipeline_mode<synchronous>, transform_indices = @transform_4, window_bounds = array<i64: 8, 16>}, {pipeline_mode = #tpu.pipeline_mode<synchronous>, transform_indices = @transform_5, window_bounds = array<i64: 8, 1>}, {pipeline_mode = #tpu.pipeline_mode<synchronous>, transform_indices = @transform_6, window_bounds = array<i64: 1, 128>}, {pipeline_mode = #tpu.pipeline_mode<synchronous>, transform_indices = @transform_7, window_bounds = array<i64: 1, 128>}, {pipeline_mode = #tpu.pipeline_mode<synchronous>, transform_indices = @transform_8, window_bounds = array<i64: 128, 128>}, {transform_indices = @transform_9, window_bounds = array<i64: 1, 8, 128>}]} {
    %c0 = arith.constant 0 : index
    %c0_0 = arith.constant 0 : index
    %c0_1 = arith.constant 0 : index
    %0 = vector.load %arg1[%c0, %c0_0, %c0_1] : memref<1x40x128xf32, #tpu.memory_space<vmem>>, vector<1x40x128xf32>
    %1 = vector.shape_cast %0 : vector<1x40x128xf32> to vector<40x128xf32>
    %c0_2 = arith.constant 0 : index
    %c0_3 = arith.constant 0 : index
    %2 = vector.load %arg3[%c0_2, %c0_3] : memref<16x40xf32, #tpu.memory_space<vmem>>, vector<16x40xf32>
    %cst = arith.constant dense<0.000000e+00> : vector<16x128xf32>
    %3 = tpu.matmul %2, %1, %cst {dimension_numbers = #tpu.dot_dimension_numbers<[1], [0], [0], [1], [0, 0, 1, 1], [], []>} : vector<16x40xf32>, vector<40x128xf32>, vector<16x128xf32> -> vector<16x128xf32>
    %c0_4 = arith.constant 0 : index
    %c0_5 = arith.constant 0 : index
    %4 = vector.load %arg4[%c0_4, %c0_5] : memref<16x1xf32, #tpu.memory_space<vmem>>, vector<16x1xf32>
    %5 = vector.broadcast %4 : vector<16x1xf32> to vector<16x128xf32>
    %6 = arith.addf %3, %5 : vector<16x128xf32>
    %c0_6 = arith.constant 0 : index
    %c0_7 = arith.constant 0 : index
    %7 = vector.load %arg5[%c0_6, %c0_7] : memref<8x16xf32, #tpu.memory_space<vmem>>, vector<8x16xf32>
    %cst_8 = arith.constant dense<0.000000e+00> : vector<8x128xf32>
    %8 = tpu.matmul %7, %6, %cst_8 {dimension_numbers = #tpu.dot_dimension_numbers<[1], [0], [0], [1], [0, 0, 1, 1], [], []>} : vector<8x16xf32>, vector<16x128xf32>, vector<8x128xf32> -> vector<8x128xf32>
    %c0_9 = arith.constant 0 : index
    %c0_10 = arith.constant 0 : index
    %9 = vector.load %arg6[%c0_9, %c0_10] : memref<8x1xf32, #tpu.memory_space<vmem>>, vector<8x1xf32>
    %10 = vector.broadcast %9 : vector<8x1xf32> to vector<8x128xf32>
    %11 = arith.addf %8, %10 : vector<8x128xf32>
    %c0_11 = arith.constant 0 : index
    %c0_12 = arith.constant 0 : index
    %c0_13 = arith.constant 0 : index
    %12 = vector.load %arg2[%c0_11, %c0_12, %c0_13] : memref<1x8x128xf32, #tpu.memory_space<vmem>>, vector<1x8x128xf32>
    %13 = vector.shape_cast %12 : vector<1x8x128xf32> to vector<8x128xf32>
    %cst_14 = arith.constant 0.000000e+00 : f32
    %14 = vector.broadcast %cst_14 : f32 to vector<8x128xf32>
    %15 = arith.maximumf %11, %14 : vector<8x128xf32>
    %16 = arith.addf %13, %15 : vector<8x128xf32>
    %c0_15 = arith.constant 0 : index
    %c0_16 = arith.constant 0 : index
    %17 = vector.load %arg9[%c0_15, %c0_16] : memref<128x128xf32, #tpu.memory_space<vmem>>, vector<128x128xf32>
    %cst_17 = arith.constant dense<0.000000e+00> : vector<8x128xf32>
    %18 = tpu.matmul %16, %17, %cst_17 {dimension_numbers = #tpu.dot_dimension_numbers<[1], [0], [0], [1], [0, 0, 1, 1], [], []>} : vector<8x128xf32>, vector<128x128xf32>, vector<8x128xf32> -> vector<8x128xf32>
    %cst_18 = arith.constant 3.125000e-02 : f32
    %19 = vector.broadcast %cst_18 : f32 to vector<8x128xf32>
    %20 = arith.mulf %18, %19 : vector<8x128xf32>
    %21 = arith.subf %16, %20 : vector<8x128xf32>
    %22 = arith.mulf %21, %21 : vector<8x128xf32>
    %c0_19 = arith.constant 0 : index
    %c0_20 = arith.constant 0 : index
    %23 = vector.load %arg9[%c0_19, %c0_20] : memref<128x128xf32, #tpu.memory_space<vmem>>, vector<128x128xf32>
    %cst_21 = arith.constant dense<0.000000e+00> : vector<8x128xf32>
    %24 = tpu.matmul %22, %23, %cst_21 {dimension_numbers = #tpu.dot_dimension_numbers<[1], [0], [0], [1], [0, 0, 1, 1], [], []>} : vector<8x128xf32>, vector<128x128xf32>, vector<8x128xf32> -> vector<8x128xf32>
    %cst_22 = arith.constant 3.125000e-02 : f32
    %25 = vector.broadcast %cst_22 : f32 to vector<8x128xf32>
    %26 = arith.mulf %24, %25 : vector<8x128xf32>
    %cst_23 = arith.constant 9.99999997E-7 : f32
    %27 = vector.broadcast %cst_23 : f32 to vector<8x128xf32>
    %28 = arith.addf %26, %27 : vector<8x128xf32>
    %29 = math.rsqrt %28 : vector<8x128xf32>
    %30 = arith.mulf %21, %29 : vector<8x128xf32>
    %c0_24 = arith.constant 0 : index
    %c0_25 = arith.constant 0 : index
    %31 = vector.load %arg7[%c0_24, %c0_25] : memref<1x128xf32, #tpu.memory_space<vmem>>, vector<1x128xf32>
    %32 = vector.broadcast %31 : vector<1x128xf32> to vector<8x128xf32>
    %33 = arith.mulf %30, %32 : vector<8x128xf32>
    %c0_26 = arith.constant 0 : index
    %c0_27 = arith.constant 0 : index
    %34 = vector.load %arg8[%c0_26, %c0_27] : memref<1x128xf32, #tpu.memory_space<vmem>>, vector<1x128xf32>
    %35 = vector.broadcast %34 : vector<1x128xf32> to vector<8x128xf32>
    %36 = arith.addf %33, %35 : vector<8x128xf32>
    %c0_28 = arith.constant 0 : index
    %c0_29 = arith.constant 0 : index
    %c0_30 = arith.constant 0 : index
    %37 = vector.load %arg10[%c0_28, %c0_29, %c0_30] : memref<1x8x128xf32, #tpu.memory_space<vmem>>, vector<1x8x128xf32>
    %38 = vector.shape_cast %37 : vector<1x8x128xf32> to vector<8x128xf32>
    %39 = vector.shape_cast %36 : vector<8x128xf32> to vector<1x8x128xf32>
    tpu.vector_store %arg10[%c0_28, %c0_29, %c0_30], %39 {strides = array<i32>} : memref<1x8x128xf32, #tpu.memory_space<vmem>>, vector<1x8x128xf32>,
    return
  }
  func.func @transform_0(%arg0: i32) -> (i32, i32, i32) {
    %c0_i32 = arith.constant 0 : i32
    %c0_i32_0 = arith.constant 0 : i32
    %c0_i32_1 = arith.constant 0 : i32
    return %arg0, %c0_i32, %c0_i32_0 : i32, i32, i32
  }
  func.func @transform_1(%arg0: i32) -> (i32, i32, i32) {
    %c0_i32 = arith.constant 0 : i32
    %c0_i32_0 = arith.constant 0 : i32
    %c0_i32_1 = arith.constant 0 : i32
    return %arg0, %c0_i32, %c0_i32_0 : i32, i32, i32
  }
  func.func @transform_2(%arg0: i32) -> (i32, i32) {
    %c0_i32 = arith.constant 0 : i32
    %c0_i32_0 = arith.constant 0 : i32
    %c0_i32_1 = arith.constant 0 : i32
    return %c0_i32, %c0_i32_0 : i32, i32
  }
  func.func @transform_3(%arg0: i32) -> (i32, i32) {
    %c0_i32 = arith.constant 0 : i32
    %c0_i32_0 = arith.constant 0 : i32
    %c0_i32_1 = arith.constant 0 : i32
    return %c0_i32, %c0_i32_0 : i32, i32
  }
  func.func @transform_4(%arg0: i32) -> (i32, i32) {
    %c0_i32 = arith.constant 0 : i32
    %c0_i32_0 = arith.constant 0 : i32
    %c0_i32_1 = arith.constant 0 : i32
    return %c0_i32, %c0_i32_0 : i32, i32
  }
  func.func @transform_5(%arg0: i32) -> (i32, i32) {
    %c0_i32 = arith.constant 0 : i32
    %c0_i32_0 = arith.constant 0 : i32
    %c0_i32_1 = arith.constant 0 : i32
    return %c0_i32, %c0_i32_0 : i32, i32
  }
  func.func @transform_6(%arg0: i32) -> (i32, i32) {
    %c0_i32 = arith.constant 0 : i32
    %c0_i32_0 = arith.constant 0 : i32
    %c0_i32_1 = arith.constant 0 : i32
    return %c0_i32, %c0_i32_0 : i32, i32
  }
  func.func @transform_7(%arg0: i32) -> (i32, i32) {
    %c0_i32 = arith.constant 0 : i32
    %c0_i32_0 = arith.constant 0 : i32
    %c0_i32_1 = arith.constant 0 : i32
    return %c0_i32, %c0_i32_0 : i32, i32
  }
  func.func @transform_8(%arg0: i32) -> (i32, i32) {
    %c0_i32 = arith.constant 0 : i32
    %c0_i32_0 = arith.constant 0 : i32
    %c0_i32_1 = arith.constant 0 : i32
    return %c0_i32, %c0_i32_0 : i32, i32
  }
  func.func @transform_9(%arg0: i32) -> (i32, i32, i32) {
    %c0_i32 = arith.constant 0 : i32
    %c0_i32_0 = arith.constant 0 : i32
    %c0_i32_1 = arith.constant 0 : i32
    return %arg0, %c0_i32, %c0_i32_0 : i32, i32, i32
  }
}

</mosaic_0001>

<bundles_post_ra>
// kernel: tpu_custom_call.1
= control target key start
LH: loop header
LB: loop body
LE: loop exit
PB: predicated region body
PF: predicated region fallthrough
CT: control target
= control target key end

     0   :  { %s1568_s0 = inlined_call_operand.hbm [shape: f32[2,40,128], index: 0, kind: input, shape index: {}]   ;;  %s1569_s1 = inlined_call_operand.vmem [shape: f32[2,8,128], index: 1, kind: input, shape index: {}]   ;;  %s1570_s2 = inlined_call_operand.hbm [shape: f32[16,40], index: 2, kind: input, shape index: {}]   ;;  %s1571_s3 = inlined_call_operand.vmem [shape: f32[16,1], index: 3, kind: input, shape index: {}]   ;;  %s1572_s4 = inlined_call_operand.vmem [shape: f32[8,16], index: 4, kind: input, shape index: {}]   ;;  %s1573_s5 = inlined_call_operand.vmem [shape: f32[8,1], index: 5, kind: input, shape index: {}]   ;;  %s1574_s6 = inlined_call_operand.vmem [shape: f32[1,128], index: 6, kind: input, shape index: {}]   ;;  %s1575_s7 = inlined_call_operand.vmem [shape: f32[1,128], index: 7, kind: input, shape index: {}]   ;;  %s1576_s8 = inlined_call_operand.hbm [shape: f32[128,128], index: 8, kind: input, shape index: {}]   ;;  %s1577_s9 = inlined_call_operand.hbm [shape: f32[2,8,128], index: 9, kind: output, shape index: {}]  }
   0x1   :  { %1584 = sst [smem:[#allocation13_spill]] %s1570_s2 }
   0x2   :  { %1585 = sst [smem:[#allocation14_spill]] %s1576_s8 }
   0x3   :  { %14 = vsyncpa [#allocation3], 0 }
   0x4   :  { %16 = vsyncpa [#allocation3 + $0x1], 0 }
   0x5   :  { %17 = vsyncpa [#allocation6], 0 }
   0x6   :  { %18 = vsyncpa [#allocation4], 0 }
   0x7   :  { %20 = vsyncpa [#allocation4 + $0x1], 0  ;;  %s1319_s30 = smov 0   ;;  %s1321_s10 = smov 0  }
   0x8   :  { %s1323_s11 = smov 0   ;;  %s1325_s12 = smov 0  }
   0x9 LB: > { %s1340_s13 = sadd.s32 4294967295, %s1258_s12   ;;  %s877_s14 = sadd.s32 4294967294, %s1258_s12   ;;  %s1258_s12 = sphi %s1325_s12, %s1608_s12   ;;  %s1254_s11 = sphi %s1323_s11, %s1607_s11   ;;  %s1250_s10 = sphi %s1321_s10, %s1606_s10   ;;  %s1246_s30 = sphi %s1319_s30, %s1605_s30  }
   0xa   : > { %p46_p0 = scmp.ne.s32.totalorder %s1250_s10, %s1246_s30  ;;  %p1580_p1 = scmp.eq.s32.totalorder %s1340_s13, 0 }
   0xb   : > { %p243_p2 = scmp.eq.s32.totalorder %s1340_s13, 1  ;;  %p249_p3 = scmp.eq.s32.totalorder %s877_s14, 1 }
   0xc   : > { %p1349_p4 = por %p1580_p1, %p46_p0  ;;  %p878_p5 = scmp.ge.s32.totalorder %s1258_s12, 1 }
   0xd   : > { %p1354_p6 = por %p249_p3, %p46_p0  ;;  %p256_p7 = scmp.lt.s32.totalorder %s1258_s12, 3 }
   0xe   : > { %s1586_s15 = scalar_select %p1349_p4, 1, 0 }
   0xf   : > { %s1587_s16 = scalar_select %p1354_p6, 1, 0 }
  0x10   : > { %p1359_p8 = pnand %p878_p5, %p256_p7  ;;  %s1260_s18 = smov [#allocation5]  }
  0x11   : > { %s268_s19 = sshll.u32 %s1260_s18, 4  ;;  %s1261_s21 = smov [#allocation7]   ;;  %s269_s19 = int_to_ptr.vmem [resolvable:$true] %s268_s19 }
  0x12   : > { %s1588_s17 = scalar_select %p1359_p8, 1, 0 }
  0x13   : > { %p1046_p9 = pneg %p1359_p8  ;;  %s296_s22 = sshll.u32 %s1261_s21, 4  ;;  %s297_s22 = int_to_ptr.vmem [resolvable:$true] %s296_s22 }
  0x14   : > { %s1121_s23 = scalar_lea.vmem %s269_s19, 256  ;;  %p1129_p5 = scmp.lt.s32.totalorder %s269_s19, %s269_s19 }
  0x15   : > { %p1368_p11 = pnand %p1046_p9, %p1580_p1  ;;  %p1122_p13 = scmp.ne.s32.totalorder %s269_s19, %s1121_s23 }
  0x16   : > { %p1130_p7 = scmp.lt.s32.totalorder %s1121_s23, %s1121_s23 }
  0x17   : > { %p1112_p12 = pneg %p1368_p11 }
  0x18   : > { %p1131_p10 = por %p1130_p7, %p1129_p5 }
  0x19   : > { %p1124_p0 = pnand %p1122_p13, %p1112_p12 }
  0x1b   : > { %p1125_p3 = pneg %p1124_p0 }
  0x1d   : > { %p1132_p9 = pnand %p1131_p10, %p1125_p3 }
  0x1f   : > { %1135 = shalt.err (!%p1132_p9)
}
  0x20   : > { %s1578_s24 = smov 128   ;;  %s1579_s25 = smov 8  }
  0x21   : > { %s1590_s2 = sld [smem:[#allocation13_spill]]  ;;  %s1147_s28 = scalar_lea.vmem %s297_s22, 2048 }
  0x22   : > { %p1148_p13 = scmp.ne.s32.totalorder %s297_s22, %s1147_s28  ;;  %p1155_p10 = scmp.lt.s32.totalorder %s297_s22, %s297_s22 }
  0x23   : > { %p1156_p3 = scmp.lt.s32.totalorder %s1147_s28, %s1147_s28 }
  0x24   : > { %p1150_p0 = pnand %p1148_p13, %p1112_p12 }
  0x25   : > { %p1157_p7 = por %p1156_p3, %p1155_p10 }
  0x26   : > { %p1151_p5 = pneg %p1150_p0 }
  0x27   : > { %1049 = dma.hbm_to_vmem [thread:$0]  (!%p1368_p11), %s1590_s2, 256, %s269_s19, [#allocation6], %s1578_s24, %s1578_s24, %s1579_s25  }
  0x28   : > { %p1158_p9 = pnand %p1157_p7, %p1151_p5 }
  0x2a   : > { %1161 = shalt.err (!%p1158_p9)
}
  0x2b   : > { %s1591_s8 = sld [smem:[#allocation14_spill]]  ;;  %s1397_s18 = sadd.s32 1, %s1258_s12  }
  0x2c   : > { %s33_s19 = sadd.s32 1, %s1254_s11  ;;  %s30_s20 = ssub.s32 %s1258_s12, %s1397_s18 }
  0x2d   : > { %p40_p12 = scmp.ne.s32.totalorder %s1254_s11, %s1250_s10  ;;  %p31_p13 = scmp.eq.s32.totalorder %s30_s20, 0 }
  0x2e   : > { %p41_p0 = scmp.eq.s32.totalorder %s1258_s12, 0  ;;  %p1063_p10 = scmp.lt.s32.totalorder %s1258_s12, 2 }
  0x2f   : > { %p1407_p5 = por %p243_p2, %p40_p12  ;;  %s310_s26 = sand.u32 1, %s1254_s11  }
  0x30   : > { %s1413_s23 = scalar_select %p31_p13, %s1254_s11, %s33_s19  }
  0x31   : > { %1052 = dma.hbm_to_vmem [thread:$0]  (!%p1368_p11), %s1591_s8, 2048, %s297_s22, [#allocation6], %s1578_s24, %s1578_s24, %s1579_s25  }
  0x32   : > { %s1592_s21 = scalar_select %p1407_p5, 1, 0 }
  0x33   : > { %1593 = sst [smem:[#allocation12_spill]] %s1413_s23  ;;  %p42_p3 = por %p41_p0, %p40_p12 }
  0x34   : > { %s1031_s27 = smul.u32 40, %s310_s26  ;;  %s1428_s25 = scalar_lea.sflag [#allocation3], %s310_s26 }
  0x35   : > { %s1032_s22 = smul.u32 640, %s1258_s12  ;;  %p1417_p11 = pnand %p1063_p10, %p42_p3 }
  0x36   : > { %s314_s24 = scalar_lea.vmem [#allocation2], %s1031_s27 }
  0x37   : > { %s1424_s20 = scalar_lea.hbm %s1568_s0, %s1032_s22  ;;  %s321_s19 = sshll.u32 %s314_s24, 4  ;;  %s1426_s19 = int_to_ptr.vmem [resolvable:$true] %s321_s19 }
  0x38   : > { %s1162_s2 = scalar_lea.hbm %s1424_s20, 640  ;;  %p1164_p7 = pneg %p1417_p11 }
  0x39   : > { %p1163_p2 = scmp.ne.s32.totalorder %s1424_s20, %s1162_s2  ;;  %s1167_s22 = scalar_lea.hbm %s1568_s0, 1280 }
  0x3a   : > { %p1168_p13 = scmp.lt.s32.totalorder %s1424_s20, %s1568_s0  ;;  %p1169_p0 = scmp.lt.s32.totalorder %s1167_s22, %s1162_s2 }
  0x3b   : > { %p1165_p9 = pnand %p1164_p7, %p1163_p2 }
  0x3c   : > { %p1170_p10 = por %p1169_p0, %p1168_p13 }
  0x3d   : > { %p1166_p12 = pneg %p1165_p9 }
  0x3f   : > { %p1171_p3 = pnand %p1170_p10, %p1166_p12 }
  0x41   : > { %1174 = shalt.err (!%p1171_p3)
}
  0x42   : > { %s1175_s24 = scalar_lea.vmem %s1426_s19, 640  ;;  %s1264_s26 = smov [#allocation2]  }
  0x43   : > { %p1176_p1 = scmp.ne.s32.totalorder %s1426_s19, %s1175_s24  ;;  %s1180_s27 = sshll.u32 %s1264_s26, 4  ;;  %s1181_s27 = int_to_ptr.vmem [resolvable:$false] %s1180_s27 }
  0x44   : > { %s1182_s8 = scalar_lea.vmem %s1181_s27, 1280  ;;  %p1183_p9 = scmp.lt.s32.totalorder %s1426_s19, %s1181_s27 }
  0x45   : > { %p1178_p6 = pnand %p1176_p1, %p1164_p7  ;;  %p1184_p5 = scmp.lt.s32.totalorder %s1182_s8, %s1175_s24 }
  0x47   : > { %p1179_p2 = pneg %p1178_p6  ;;  %p1185_p4 = por %p1184_p5, %p1183_p9 }
  0x49   : > { %p1186_p8 = pnand %p1185_p4, %p1179_p2 }
  0x4b   : > { %1189 = shalt.err (!%p1186_p8)
}
  0x4c   : > { %s1595_s2 = smov 8   ;;  %s1596_s23 = smov 128  }
  0x4d   : > { %1056 = dma.hbm_to_vmem [thread:$0]  (!%p1417_p11), %s1424_s20, 640, %s1426_s19, %s1428_s25, %s1596_s23, %s1596_s23, %s1595_s2  }
  0x4e   : > { %p1597_p1 = scmp.ne.s32.totalorder %s1588_s17, 0 }
  0x4f   : > { %s1455_s29 = sand.u32 (!%p1597_p1), 1, %s1250_s10   ;;  %p1598_p4 = scmp.ne.s32.totalorder (!%p1597_p1), %s1586_s15, 0 }
  0x50   : > { %340 = sbr.rel (%p1597_p1) target bundleno = 927 (0x39f), region = 56  ;;  %s343_s14 = scalar_lea.sflag (!%p1597_p1), [#allocation3], %s1455_s29 }
  0x51   : > { %s1033_s22 = smul.u32 (!%p1597_p1), 40, %s1455_s29 }
  0x53   : > { %s346_s24 = scalar_lea.vmem (!%p1597_p1), [#allocation2], %s1033_s22 }
  0x55   : > { %1233 = dma.done.wait (%p1598_p4), %s343_s14, 640  }
  0x56   : > { %1235 = vsyncadd (%p1598_p4), %s343_s14, 4294966656  ;;  %p1599_p6 = scmp.eq.s32.totalorder %s1340_s13, 0 }
  0x58   : > { %1237 = dma.done.wait (%p1599_p6), [#allocation6], 2304   ;;  %p1600_p8 = pmov %p1599_p6 }
  0x59   : > { %v1265_v0 = vmov 0   ;;  %vm416_vm0 = vcmask 326656   ;;  %v401_v1 = vld [vmem:[%s346_s24 + $0x20] sm:$0xff]  ;;  %v400_v2 = vld [vmem:[%s346_s24 + $0x18] sm:$0xff]  ;;  %v402_v3 = vld [vmem:[#allocation5] sm:$0xff]  ;;  %v1266_v10 = vmov 0.0  }
  0x5a   : > { %1239 = vsyncadd (%p1600_p8), [#allocation6], 4294964992  ;;  %1106 = vset.pattern.permute.xlu0 %v1265_v0  ;;  %1107 = vset.pattern.permute.xlu1 %v1265_v0  ;;  %v399_v4 = vld [vmem:[%s346_s24 + $0x10] sm:$0xff]  ;;  %v405_v5 = vld [vmem:[%s1571_s3 + $0x8] sm:$0xff]  ;;  %vm1267_vm1 = vmmov 0   ;;  %vm505_vm2 = vcmask 130048  }
  0x5b   : > { %941 = vmatprep.subr.mxu0 %v401_v1  ;;  %951 = vmatprep.mubr.msk.f32.mxu0 %vm416_vm0, %v402_v3  ;;  %v398_v6 = vld [vmem:[%s346_s24 + $0x8] sm:$0xff]  ;;  %v404_v7 = vld [vmem:[%s1571_s3] sm:$0xff]  ;;  %v403_v9 = vld [vmem:[#allocation5 + $0x8] sm:$0xff]  ;;  %p393_p5 = scmp.lt.s32.totalorder %s1340_s13, 1  ;;  %s894_s20 = sshll.u32 %s1340_s13, 7 }
  0x5c   : > { %942 = vmatpush3.msra.mxu0 %v401_v1  ;;  %413 = vperm.xlu0 %1106, %v405_v5   ;;  %v397_v8 = vld [vmem:[%s346_s24] sm:$0xff]  ;;  %v597_v12 = vld [vmem:[#allocation7 + $0x78] sm:$0xff]  ;;  %v596_v13 = vld [vmem:[#allocation7 + $0x70] sm:$0xff]  ;;  %s886_s24 = sshll.u32 %s1455_s29, 3  ;;  %s763_s23 = scalar_lea.sflag [#allocation4], %s1455_s29 }
  0x5d   : > { %943 = vmatprep.subr.mxu0 %v400_v2  ;;  %954 = vmatprep.subr.mxu1 %v1266_v10  ;;  %v499_v11 = vld [vmem:[%s1573_s5] sm:$0xff]  ;;  %v595_v14 = vld [vmem:[#allocation7 + $0x68] sm:$0xff]  ;;  %v593_v16 = vld [vmem:[#allocation7 + $0x58] sm:$0xff]  ;;  %s394_s8 = scalar_select %p393_p5, %s1340_s13, 1 }
  0x5e   : > { %944 = vmatpush3.msra.mxu0 %v400_v2  ;;  %958 = vmatprep.mubr.msk.f32.mxu1 %vm1267_vm1, %v1266_v10  ;;  %v594_v15 = vld [vmem:[#allocation7 + $0x60] sm:$0xff]  ;;  %v592_v17 = vld [vmem:[#allocation7 + $0x50] sm:$0xff]  ;;  %v591_v18 = vld [vmem:[#allocation7 + $0x48] sm:$0xff]  ;;  %s392_s19 = scalar_lea.vmem [#allocation8], %s886_s24  ;;  %p1601_p7 = scmp.ne.s32.totalorder %s1592_s21, 0 }
  0x5f   : > { %945 = vmatprep.subr.mxu0 %v399_v4  ;;  %502 = vperm.xlu1 %1107, %v499_v11   ;;  %v590_v19 = vld [vmem:[#allocation7 + $0x40] sm:$0xff]  ;;  %v589_v20 = vld [vmem:[#allocation7 + $0x38] sm:$0xff]  ;;  %v588_v21 = vld [vmem:[#allocation7 + $0x30] sm:$0xff]  ;;  %s887_s2 = sshll.u32 %s394_s8, 3  ;;  %s776_s26 = sshll.u32 %s392_s19, 4  ;;  %s777_s26 = int_to_ptr.vmem [resolvable:$true] %s776_s26 }
  0x60   : > { %946 = vmatpush3.msra.mxu0 %v399_v4  ;;  %408 = vperm.xlu0 %1106, %v404_v7   ;;  %v587_v22 = vld [vmem:[#allocation7 + $0x28] sm:$0xff]  ;;  %v586_v23 = vld [vmem:[#allocation7 + $0x20] sm:$0xff]  ;;  %v585_v31 = vld [vmem:[#allocation7 + $0x18] sm:$0xff]  ;;  %s396_s14 = scalar_lea.vmem %s1569_s1, %s887_s2  ;;  %s774_s2 = scalar_lea.hbm %s1577_s9, %s894_s20 }
  0x61   : > { %947 = vmatprep.subr.mxu0 %v398_v6  ;;  %v498_v30 = vld [vmem:[%s1572_s4] sm:$0xff]  ;;  %v584_v32 = vld [vmem:[#allocation7 + $0x10] sm:$0xff]  ;;  %v583_v33 = vld [vmem:[#allocation7 + $0x8] sm:$0xff]  ;;  %s1190_s22 = scalar_lea.vmem %s777_s26, 128 }
  0x62   : > { %948 = vmatpush3.msra.mxu0 %v398_v6  ;;  %v582_v34 = vld [vmem:[#allocation7] sm:$0xff]  ;;  %p1191_p11 = scmp.ne.s32.totalorder %s777_s26, %s1190_s22 }
  0x63   : > { %949 = vmatprep.subr.mxu0 %v397_v8  ;;  %v579_v38 = vld [vmem:[%s396_s14] sm:$0xff]  ;;  %s1268_s14 = smov [#allocation8]  }
  0x64   : > { %950 = vmatpush3.msra.mxu0 %v397_v8  ;;  %v891_v52 = vld [vmem:[%s1574_s6] ss:$0 sm:$0xff]  ;;  %p1192_p12 = pnand %p1191_p11, %p1601_p7  ;;  %s1194_s15 = sshll.u32 %s1268_s14, 4  ;;  %s1195_s15 = int_to_ptr.vmem [resolvable:$false] %s1194_s15 }
  0x65   : > { %952 = vmatmul.mubr.msk.f32.vlgmr.msra.gmra.mxu0 %vm416_vm0, %v403_v9  ;;  %996 = vmatprep.subr.mxu0 %v1266_v10  ;;  %v892_v54 = vld [vmem:[%s1575_s7] ss:$0 sm:$0xff]  ;;  %s1196_s13 = scalar_lea.vmem %s1195_s15, 256  ;;  %p1197_p0 = scmp.lt.s32.totalorder %s777_s26, %s1195_s15 }
  0x66   : > { %1028 = vmatprep.mubr.msk.f32.mxu0 %vm1267_vm1, %v1266_v10  ;;  %997 = vmatpush3.msra.mxu0 %v597_v12  ;;  %p1193_p13 = pneg %p1192_p12  ;;  %p1198_p10 = scmp.lt.s32.totalorder %s1196_s13, %s1190_s22 }
  0x67   : > { %998 = vmatprep.subr.mxu0 %v1266_v10 }
  0x68   : > { %999 = vmatpush3.msra.mxu0 %v596_v13  ;;  %p1199_p3 = por %p1198_p10, %p1197_p0 }
  0x69   : > { %1000 = vmatprep.subr.mxu0 %v1266_v10 }
  0x6a   : > { %1001 = vmatpush3.msra.mxu0 %v595_v14  ;;  %p1200_p2 = pnand %p1199_p3, %p1193_p13 }
  0x6b   : > { %1002 = vmatprep.subr.mxu0 %v1266_v10 }
  0x6c   : > { %1003 = vmatpush3.msra.mxu0 %v594_v15 }
  0x6d   : > { %1004 = vmatprep.subr.mxu0 %v1266_v10 }
  0x6e   : > { %1005 = vmatpush3.msra.mxu0 %v593_v16 }
  0x6f   : > { %1006 = vmatprep.subr.mxu0 %v1266_v10 }
  0x70   : > { %1007 = vmatpush3.msra.mxu0 %v592_v17 }
  0x71   : > { %1008 = vmatprep.subr.mxu0 %v1266_v10 }
  0x72   : > { %1009 = vmatpush3.msra.mxu0 %v591_v18 }
  0x73   : > { %1010 = vmatprep.subr.mxu0 %v1266_v10 }
  0x74   : > { %1011 = vmatpush3.msra.mxu0 %v590_v19 }
  0x75   : > { %1012 = vmatprep.subr.mxu0 %v1266_v10 }
  0x76   : > { %1013 = vmatpush3.msra.mxu0 %v589_v20 }
  0x77   : > { %1014 = vmatprep.subr.mxu0 %v1266_v10 }
  0x78   : > { %1015 = vmatpush3.msra.mxu0 %v588_v21 }
  0x79   : > { %1016 = vmatprep.subr.mxu0 %v1266_v10 }
  0x7a   : > { %1017 = vmatpush3.msra.mxu0 %v587_v22 }
  0x7b   : > { %1018 = vmatprep.subr.mxu0 %v1266_v10 }
  0x7c   : > { %1019 = vmatpush3.msra.mxu0 %v586_v23 }
  0x7d   : > { %1020 = vmatprep.subr.mxu0 %v1266_v10 }
  0x7e   : > { %1021 = vmatpush3.msra.mxu0 %v585_v31 }
  0x7f   : > { %1022 = vmatprep.subr.mxu0 %v1266_v10 }
  0x80   : > { %1023 = vmatpush3.msra.mxu0 %v584_v32 }
  0x81   : > { %1024 = vmatprep.subr.mxu0 %v1266_v10 }
  0x82   : > { %1025 = vmatpush3.msra.mxu0 %v583_v33 }
  0x83   : > { %1026 = vmatprep.subr.mxu0 %v1266_v10 }
  0x84   : > { %1027 = vmatpush3.msra.mxu0 %v582_v34 }
  0xd7   : > { %v414_v24 = vpop.permute.xlu0 %413 }
  0xda   : > { %v503_v35 = vpop.permute.xlu1 %502 }
  0xdb   : > { %v409_v27 = vpop.permute.xlu0 %408 }
 0x125   : > { %v953_v25 = vpop.f32.mrf.mxu0 }
 0x126   : > { %v495_v26 = vadd.f32 %v953_v25, %v414_v24 }
 0x127   : > { %v489_v28 = vpop.f32.mrf.mxu0 }
 0x128   : > { %v490_v29 = vadd.f32 %v489_v28, %v409_v27  ;;  %955 = vmatpush3.msra.mxu1 %v495_v26 }
 0x129   : > { %956 = vmatprep.subr.mxu1 %v1266_v10 }
 0x12a   : > { %957 = vmatpush3.msra.mxu1 %v490_v29 }
 0x12b   : > { %959 = vmatmul.mubr.msk.f32.vlgmr.msra.gmra.mxu1 %vm505_vm2, %v498_v30  ;;  %961 = vmatprep.subr.mxu1 %v1266_v10 }
 0x12c   : > { %962 = vmatpush3.msra.mxu1 %v597_v12  ;;  %993 = vmatprep.mubr.msk.f32.mxu1 %vm1267_vm1, %v1266_v10 }
 0x12d   : > { %963 = vmatprep.subr.mxu1 %v1266_v10 }
 0x12e   : > { %964 = vmatpush3.msra.mxu1 %v596_v13 }
 0x12f   : > { %965 = vmatprep.subr.mxu1 %v1266_v10 }
 0x130   : > { %966 = vmatpush3.msra.mxu1 %v595_v14 }
 0x131   : > { %967 = vmatprep.subr.mxu1 %v1266_v10 }
 0x132   : > { %968 = vmatpush3.msra.mxu1 %v594_v15 }
 0x133   : > { %969 = vmatprep.subr.mxu1 %v1266_v10 }
 0x134   : > { %970 = vmatpush3.msra.mxu1 %v593_v16 }
 0x135   : > { %971 = vmatprep.subr.mxu1 %v1266_v10 }
 0x136   : > { %972 = vmatpush3.msra.mxu1 %v592_v17 }
 0x137   : > { %973 = vmatprep.subr.mxu1 %v1266_v10 }
 0x138   : > { %974 = vmatpush3.msra.mxu1 %v591_v18 }
 0x139   : > { %975 = vmatprep.subr.mxu1 %v1266_v10 }
 0x13a   : > { %976 = vmatpush3.msra.mxu1 %v590_v19 }
 0x13b   : > { %977 = vmatprep.subr.mxu1 %v1266_v10 }
 0x13c   : > { %978 = vmatpush3.msra.mxu1 %v589_v20 }
 0x13d   : > { %979 = vmatprep.subr.mxu1 %v1266_v10 }
 0x13e   : > { %980 = vmatpush3.msra.mxu1 %v588_v21 }
 0x13f   : > { %981 = vmatprep.subr.mxu1 %v1266_v10 }
 0x140   : > { %982 = vmatpush3.msra.mxu1 %v587_v22 }
 0x141   : > { %983 = vmatprep.subr.mxu1 %v1266_v10 }
 0x142   : > { %984 = vmatpush3.msra.mxu1 %v586_v23 }
 0x143   : > { %985 = vmatprep.subr.mxu1 %v1266_v10 }
 0x144   : > { %986 = vmatpush3.msra.mxu1 %v585_v31 }
 0x145   : > { %987 = vmatprep.subr.mxu1 %v1266_v10 }
 0x146   : > { %988 = vmatpush3.msra.mxu1 %v584_v32 }
 0x147   : > { %989 = vmatprep.subr.mxu1 %v1266_v10 }
 0x148   : > { %990 = vmatpush3.msra.mxu1 %v583_v33 }
 0x149   : > { %991 = vmatprep.subr.mxu1 %v1266_v10 }
 0x14a   : > { %992 = vmatpush3.msra.mxu1 %v582_v34 }
 0x1eb   : > { %v575_v36 = vpop.f32.mrf.mxu1 }
 0x1ec   : > { %v576_v37 = vadd.f32 %v575_v36, %v503_v35 }
 0x1ed   : > { %v960_v39 = vpop.f32.mrf.mxu1 }
 0x1ee   : > { %v580_v40 = vmax.f32 %v576_v37, 0.0 }
 0x1f0   : > { %v581_v41 = vadd.f32 %v580_v40, %v579_v38 }
 0x1f2   : > { %994 = vmatmul.mubr.f32.vlgmr.msra.gmra.mxu1 %v581_v41 }
 0x2b2   : > { %v664_v42 = vpop.f32.mrf.mxu1 }
 0x2b3   : > { %v668_v43 = vmul.f32 0.03125, %v664_v42 }
 0x2b4   : > { %v995_v44 = vpop.f32.mrf.mxu1 }
 0x2b5   : > { %v669_v45 = vsub.f32 %v581_v41, %v668_v43 }
 0x2b7   : > { %v670_v46 = vmul.f32 %v669_v45, %v669_v45 }
 0x2b9   : > { %1029 = vmatmul.mubr.f32.vlgmr.msra.gmra.mxu0 %v670_v46 }
 0x379   : > { %v737_v47 = vpop.f32.mrf.mxu0 }
 0x37a   : > { %v741_v48 = vmul.f32 0.03125, %v737_v47 }
 0x37b   : > { %v1030_v49 = vpop.f32.mrf.mxu0 }
 0x37c   : > { %v742_v50 = vadd.f32 1e-06, %v741_v48 }
 0x37e   : > { %1108 = vrsqrt.f32 %v742_v50 }
 0x38b   : > { %v1109_v51 = vpop.eup %1108 }
 0x38c   : > { %v744_v53 = vmul.f32 %v1109_v51, %v669_v45 }
 0x38e   : > { %v752_v55 = vmul.f32 %v891_v52, %v744_v53 }
 0x390   : > { %v760_v56 = vadd.f32 %v892_v54, %v752_v55 }
 0x392   : > { %761 = vst [vmem:[%s392_s19] sm:$0xff] %v760_v56 }
 0x393   : > { %1203 = shalt.err (!%p1200_p2)
}
 0x394   : > { %s1204_s24 = scalar_lea.hbm %s774_s2, 128  ;;  %s1208_s25 = scalar_lea.hbm %s1577_s9, 256 }
 0x395   : > { %p1205_p9 = scmp.ne.s32.totalorder %s774_s2, %s1204_s24  ;;  %p1209_p6 = scmp.lt.s32.totalorder %s774_s2, %s1577_s9 }
 0x396   : > { %p1210_p8 = scmp.lt.s32.totalorder %s1208_s25, %s1204_s24 }
 0x397   : > { %p1206_p1 = pnand %p1205_p9, %p1601_p7 }
 0x398   : > { %p1211_p5 = por %p1210_p8, %p1209_p6 }
 0x399   : > { %p1207_p4 = pneg %p1206_p1 }
 0x39b   : > { %p1212_p11 = pnand %p1211_p5, %p1207_p4 }
 0x39d   : > { %1215 = shalt.err (!%p1212_p11)
}
 0x39e   : > { %1044 = dma.vmem_to_hbm [thread:$0]  (%p1601_p7), %s777_s26, 128, %s774_s2, %s763_s23  }
 0x39f PF: > { %s788_s19 = sand.u32 1, %s1246_s30   ;;  %p1602_p12 = scmp.ne.s32.totalorder %s1587_s16, 0 }
 0x3a0   : > { %p1603_p13 = scmp.ge.s32.totalorder %s1258_s12, 2  ;;  %s789_s27 = scalar_lea.sflag [#allocation4], %s788_s19 }
 0x3a2   : > { %p1058_p0 = pnand %p1603_p13, %p1602_p12 }
 0x3a4   : > { %p1059_p10 = pneg %p1058_p0 }
 0x3a6   : > { %1241 = dma.done.wait (%p1059_p10), %s789_s27, 128  }
 0x3a7   : > { %1243 = vsyncadd (%p1059_p10), %s789_s27, 4294967168  ;;  %s1604_s8 = sld [smem:[#allocation12_spill]]  ;;  %p23_p3 = scmp.ge.s32.totalorder %s1397_s18, 4  }
 0x3a8   : > { %s1605_s30 = smov %s1250_s10  ;;  %s1606_s10 = smov %s1254_s11 }
 0x3a9   : > { %s1608_s12 = smov %s1397_s18  ;;  %25 = sbr.rel (!%p23_p3) target bundleno = 9 (0x9), region = 112 }
 0x3ad   : > { %s1607_s11 = smov %s1604_s8 }
 0x3ae   :  { %794 = vsyncpa [#allocation3], 1 }
 0x3af   :  { %796 = vsyncpa [#allocation3 + $0x1], 1 }
 0x3b0   :  { %797 = vsyncpa [#allocation6], 1 }
 0x3b1   :  { %798 = vsyncpa [#allocation4], 1 }
 0x3b2   :  { %800 = vsyncpa [#allocation4 + $0x1], 1 }

</bundles_post_ra>
